<compile_context>
chip_gen: v5e
topology: v5e:2x2
jax: 0.10.0
libtpu: 0.0.40
codegen_flags: <defaults>
</compile_context>

<pallas_src>
import math
import functools

import jax
import jax.numpy as jnp
from jax import lax
from jax.experimental import pallas as pl
from jax.experimental.pallas import tpu as pltpu

LN_EPS = 1e-5
NEG_INF = -1e30                    # finite "minus infinity" (avoids exp NaNs)


# --------------------------------------------------------------------------
# Generation-aware budgets / tiling helpers
# --------------------------------------------------------------------------
def _device_kind():
    try:
        return jax.devices()[0].device_kind.lower()
    except Exception:
        return ""


def _vmem_budget(kind):
    """Scoped-VMEM budget in bytes (~60% of physical, capped at 48 MiB)."""
    try:
        cap = int(pltpu.get_tpu_info().vmem_capacity_bytes)
    except Exception:
        cap = (64 if "v7" in kind else 128) * 1024 * 1024
    return int(min(cap * 0.6, 48 * 1024 * 1024))


def _pick_tile(dim, target, align):
    """Largest tile <= target that divides `dim` and is a multiple of `align`;
    falls back to the full extent (always a legal Pallas block)."""
    if dim <= target:
        return dim
    t = (target // align) * align
    while t >= align:
        if dim % t == 0:
            return t
        t -= align
    return dim


def _row_tile(BT, C, budget, kind):
    """Row tile for kernels 1 & 3: as large as the per-row VMEM cost allows
    (amortizes any weight streaming that is still needed)."""
    target = 1024 if "v5" in kind else 512
    cap = max(8, (budget // (40 * C)) // 8 * 8)   # ~40 B/row/feature resident
    return _pick_tile(BT, min(target, cap), 8)


def _col_tile(in_dim, out_dim, budget, frac):
    """Column tile for a streamed (in_dim, out_dim) bf16 weight.  Returns the
    full extent (=> grid-invariant block index => loaded from HBM exactly
    once) when the double-buffered block fits `frac` of the budget."""
    if in_dim * out_dim * 2 * 2 <= frac * budget:
        return out_dim
    target = max(128, int(frac * budget / (4 * in_dim)) // 128 * 128)
    return _pick_tile(out_dim, target, 128)


def _ffn_tile(C, H, budget, frac):
    """Hidden tile for the FFN: accounts for both W1 (C,TH) and W2 (TH,C)."""
    if 2 * (C * H * 2) * 2 <= frac * budget:
        return H
    target = max(128, int(frac * budget / (8 * C)) // 128 * 128)
    return _pick_tile(H, target, 128)


def _layernorm(x, gamma, beta):
    mu = jnp.mean(x, axis=-1, keepdims=True)
    var = jnp.mean((x - mu) ** 2, axis=-1, keepdims=True)
    return (x - mu) * lax.rsqrt(var + LN_EPS) * gamma + beta


# --------------------------------------------------------------------------
# Kernel 1: LayerNorm1 + fused QKV projection.
# grid = (row tiles of B*T, column tiles of 3C)
# NOTE: the column axis must stay "arbitrary" — h_s is only computed at j==0.
# --------------------------------------------------------------------------
def _ln_qkv_kernel(x_ref, g_ref, b_ref, w_ref, bias_ref, o_ref, h_s):
    @pl.when(pl.program_id(1) == 0)
    def _():
        h_s[...] = _layernorm(x_ref[...], g_ref[0], b_ref[0]).astype(jnp.bfloat16)

    y = jnp.dot(h_s[...], w_ref[...],
                preferred_element_type=jnp.float32) + bias_ref[0]
    o_ref[...] = y.astype(o_ref.dtype)


# --------------------------------------------------------------------------
# Kernel 2: flash-style causal attention over (B*n_head, T, D) q/k/v.
# grid = (B*n_head, q tiles, k tiles) ; k tiles is the reduction ("arbitrary").
# --------------------------------------------------------------------------
def _flash_kernel(q_ref, k_ref, v_ref, o_ref, q_s, m_s, l_s, acc_s,
                  *, tq, tk, scale):
    qi = pl.program_id(1)
    ki = pl.program_id(2)
    q_start = qi * tq
    k_start = ki * tk

    @pl.when(ki == 0)
    def _():
        # Fold 1/sqrt(D) into q once per q-tile (not per (tq,tk) score tile).
        q_s[...] = (q_ref[0].astype(jnp.float32) * scale).astype(jnp.bfloat16)
        m_s[...] = jnp.full_like(m_s, NEG_INF)
        l_s[...] = jnp.zeros_like(l_s)
        acc_s[...] = jnp.zeros_like(acc_s)

    def update(masked):
        k = k_ref[0]                                    # (tk, D) bf16
        v = v_ref[0]                                    # (tk, D) bf16
        # q @ k^T without an explicit transpose: contract last dim of both.
        s = lax.dot_general(q_s[...], k, (((1,), (1,)), ((), ())),
                            preferred_element_type=jnp.float32)
        if masked:
            rows = q_start + lax.broadcasted_iota(jnp.int32, (tq, tk), 0)
            cols = k_start + lax.broadcasted_iota(jnp.int32, (tq, tk), 1)
            s = jnp.where(cols <= rows, s, NEG_INF)
        m_prev = m_s[...]
        m_new = jnp.maximum(m_prev, jnp.max(s, axis=-1, keepdims=True))
        alpha = jnp.exp(m_prev - m_new)
        p = jnp.exp(s - m_new)
        l_s[...] = alpha * l_s[...] + jnp.sum(p, axis=-1, keepdims=True)
        acc_s[...] = alpha * acc_s[...] + jnp.dot(
            p.astype(jnp.bfloat16), v, preferred_element_type=jnp.float32)
        m_s[...] = m_new

    # Fully at/below the diagonal: no mask work at all (pure VPU saving).
    @pl.when(k_start + tk - 1 <= q_start)
    def _():
        update(False)

    # Tile crosses the diagonal (and is not fully above it): masked update.
    @pl.when((k_start + tk - 1 > q_start) & (k_start <= q_start + tq - 1))
    def _():
        update(True)

    # Tiles fully above the diagonal fall through (and their K/V index maps
    # are clamped wrapper-side, so they cost no DMA either).

    @pl.when(ki == pl.num_programs(2) - 1)
    def _():
        inv_l = pl.reciprocal(l_s[...], approx=True)     # EUP slot
        o_ref[0] = (acc_s[...] * inv_l).astype(o_ref.dtype)


# --------------------------------------------------------------------------
# Kernel 3: attention projection + residual + LayerNorm2 + H-tiled FFN + residual.
# grid = (row tiles of B*T, hidden tiles of 4C)
# NOTE: the hidden axis must stay "arbitrary" — x1/h2/acc set only at ht==0.
# --------------------------------------------------------------------------
def _proj_ffn_kernel(x_ref, ctx_ref, wp_ref, bp_ref, ln2g_ref, ln2b_ref,
                     w1_ref, b1_ref, w2_ref, b2_ref, o_ref,
                     x1_s, h2_s, acc_s):
    ht = pl.program_id(1)

    @pl.when(ht == 0)
    def _():
        attn = jnp.dot(ctx_ref[...], wp_ref[...],
                       preferred_element_type=jnp.float32) + bp_ref[0]
        x1 = x_ref[...] + attn                           # residual 1 (f32)
        x1_s[...] = x1
        h2_s[...] = _layernorm(x1, ln2g_ref[0], ln2b_ref[0]).astype(jnp.bfloat16)
        acc_s[...] = jnp.zeros_like(acc_s)

    hidden = jnp.dot(h2_s[...], w1_ref[...],
                     preferred_element_type=jnp.float32) + b1_ref[0]
    hidden = jax.nn.gelu(hidden, approximate=False)      # exact erf = nn.GELU()
    acc_s[...] += jnp.dot(hidden.astype(jnp.bfloat16), w2_ref[...],
                          preferred_element_type=jnp.float32)

    @pl.when(ht == pl.num_programs(1) - 1)
    def _():
        o_ref[...] = (x1_s[...] + acc_s[...] + b2_ref[0]).astype(o_ref.dtype)


# --------------------------------------------------------------------------
# Wrapper
# --------------------------------------------------------------------------
def transformer_block(x, params, *, n_head):
    """x: (B, T, C) float32. params: dict (weights bf16, biases/LN f32)."""
    B, T, C = x.shape
    H = 4 * C
    D = C // n_head
    BT = B * T
    BH = B * n_head
    f32, bf16 = jnp.float32, jnp.bfloat16

    kind = _device_kind()
    budget = _vmem_budget(kind)
    is_v5 = "v5" in kind

    TR = _row_tile(BT, C, budget, kind)          # row tile (kernels 1 & 3)
    TQ = _pick_tile(T, 128, 8)                   # q tile
    TK = _pick_tile(T, 128 if is_v5 else 256, 8) # k tile: 256 feeds 2x256^2 MXU
    TN = _col_tile(C, 3 * C, budget, 0.5)        # QKV weight column tile
    TH = _ffn_tile(C, H, budget, 0.4)            # FFN hidden tile (W1 & W2)

    def cparams(sem):
        return pltpu.CompilerParams(dimension_semantics=sem,
                                    vmem_limit_bytes=budget)

    x2d = x.reshape(BT, C)
    wqkv, bqkv = params["wqkv"], params["bqkv"]  # fused once in init_params

    # ---- kernel 1: LN1 + QKV projection → (BT, 3C) bf16 ----
    # When TN == 3C the Wqkv block index is constant across the whole grid,
    # so the weight is DMA'd from HBM exactly once (no per-row re-stream).
    qkv = pl.pallas_call(
        _ln_qkv_kernel,
        out_shape=jax.ShapeDtypeStruct((BT, 3 * C), bf16),
        grid_spec=pltpu.PrefetchScalarGridSpec(
            num_scalar_prefetch=0,
            grid=(BT // TR, (3 * C) // TN),
            in_specs=[
                pl.BlockSpec((TR, C), lambda r, j: (r, 0)),      # x rows
                pl.BlockSpec((1, C), lambda r, j: (0, 0)),       # ln1 gamma
                pl.BlockSpec((1, C), lambda r, j: (0, 0)),       # ln1 beta
                pl.BlockSpec((C, TN), lambda r, j: (0, j)),      # Wqkv tile
                pl.BlockSpec((1, TN), lambda r, j: (0, j)),      # bqkv tile
            ],
            out_specs=pl.BlockSpec((TR, TN), lambda r, j: (r, j)),
            scratch_shapes=[pltpu.VMEM((TR, C), bf16)],
        ),
        compiler_params=cparams(("parallel", "arbitrary")),
    )(x2d, params["ln1_g"], params["ln1_b"], wqkv, bqkv)

    # Head split — wrapper-side layout plumbing (D < 128 here, so in-kernel
    # per-head lane slicing would force masked stores; keep XLA transposes).
    qkv5 = qkv.reshape(B, T, 3, n_head, D)
    q = qkv5[:, :, 0].transpose(0, 2, 1, 3).reshape(BH, T, D)
    k = qkv5[:, :, 1].transpose(0, 2, 1, 3).reshape(BH, T, D)
    v = qkv5[:, :, 2].transpose(0, 2, 1, 3).reshape(BH, T, D)

    # ---- kernel 2: flash causal attention → (BH, T, D) bf16 ----
    scale = 1.0 / math.sqrt(D)
    flash = functools.partial(_flash_kernel, tq=TQ, tk=TK, scale=scale)

    # Clamp K/V block indices to the causal range: above-diagonal grid steps
    # re-reference the already-resident block => no wasted HBM DMA.
    def kv_map(b, qi, ki):
        return (b, jnp.minimum(ki, (qi * TQ + TQ - 1) // TK), 0)

    ctx = pl.pallas_call(
        flash,
        out_shape=jax.ShapeDtypeStruct((BH, T, D), bf16),
        grid_spec=pltpu.PrefetchScalarGridSpec(
            num_scalar_prefetch=0,
            grid=(BH, T // TQ, T // TK),
            in_specs=[
                pl.BlockSpec((1, TQ, D), lambda b, qi, ki: (b, qi, 0)),
                pl.BlockSpec((1, TK, D), kv_map),
                pl.BlockSpec((1, TK, D), kv_map),
            ],
            out_specs=pl.BlockSpec((1, TQ, D), lambda b, qi, ki: (b, qi, 0)),
            scratch_shapes=[
                pltpu.VMEM((TQ, D), bf16),   # pre-scaled q
                pltpu.VMEM((TQ, 1), f32),    # running max
                pltpu.VMEM((TQ, 1), f32),    # running denom
                pltpu.VMEM((TQ, D), f32),    # output accumulator
            ],
        ),
        compiler_params=cparams(("parallel", "parallel", "arbitrary")),
    )(q, k, v)

    # Merge heads back to (BT, C).
    ctx2d = ctx.reshape(B, n_head, T, D).transpose(0, 2, 1, 3).reshape(BT, C)

    # ---- kernel 3: attn proj + residual + LN2 + H-tiled FFN + residual ----
    # When TH == H, W1/W2 block indices are constant across the grid (single
    # HBM load); Wproj's index map is always constant (single load).
    out2d = pl.pallas_call(
        _proj_ffn_kernel,
        out_shape=jax.ShapeDtypeStruct((BT, C), x.dtype),
        grid_spec=pltpu.PrefetchScalarGridSpec(
            num_scalar_prefetch=0,
            grid=(BT // TR, H // TH),
            in_specs=[
                pl.BlockSpec((TR, C), lambda r, ht: (r, 0)),     # x (residual)
                pl.BlockSpec((TR, C), lambda r, ht: (r, 0)),     # attention ctx
                pl.BlockSpec((C, C), lambda r, ht: (0, 0)),      # Wproj
                pl.BlockSpec((1, C), lambda r, ht: (0, 0)),      # bproj
                pl.BlockSpec((1, C), lambda r, ht: (0, 0)),      # ln2 gamma
                pl.BlockSpec((1, C), lambda r, ht: (0, 0)),      # ln2 beta
                pl.BlockSpec((C, TH), lambda r, ht: (0, ht)),    # W1 tile
                pl.BlockSpec((1, TH), lambda r, ht: (0, ht)),    # b1 tile
                pl.BlockSpec((TH, C), lambda r, ht: (ht, 0)),    # W2 tile
                pl.BlockSpec((1, C), lambda r, ht: (0, 0)),      # b2
            ],
            out_specs=pl.BlockSpec((TR, C), lambda r, ht: (r, 0)),
            scratch_shapes=[
                pltpu.VMEM((TR, C), f32),    # x1 (post-attention residual)
                pltpu.VMEM((TR, C), bf16),   # LN2(x1), cached for all H tiles
                pltpu.VMEM((TR, C), f32),    # FFN accumulator
            ],
        ),
        compiler_params=cparams(("parallel", "arbitrary")),
    )(x2d, ctx2d, params["wp"], params["bp"], params["ln2_g"], params["ln2_b"],
      params["w1"], params["b1"], params["w2"], params["b2"])

    return out2d.reshape(B, T, C)


# --------------------------------------------------------------------------
# Parameters / reference
# --------------------------------------------------------------------------
def init_params(key, n_embd):
    """Deterministic synthetic parameters.
    Matmul weights stored bf16 as (in, out) == torch weight.T; biases / LN f32.
    The QKV weight/bias are fused once here (never re-built per forward)."""
    C = n_embd
    H = 4 * C
    ks = jax.random.split(key, 9)
    std = 0.02
    f32, bf16 = jnp.float32, jnp.bfloat16

    def w(k, shape):
        return (std * jax.random.normal(k, shape, f32)).astype(bf16)

    wq, wk, wv = w(ks[0], (C, C)), w(ks[1], (C, C)), w(ks[2], (C, C))
    bq = std * jax.random.normal(ks[3], (1, C), f32)
    bk = std * jax.random.normal(ks[4], (1, C), f32)
    bv = std * jax.random.normal(ks[5], (1, C), f32)

    return {
        "ln1_g": jnp.ones((1, C), f32),
        "ln1_b": jnp.zeros((1, C), f32),
        "wqkv": jnp.concatenate([wq, wk, wv], axis=1),   # (C, 3C) bf16
        "bqkv": jnp.concatenate([bq, bk, bv], axis=1),   # (1, 3C) f32
        "wp": w(ks[6], (C, C)),
        "bp": jnp.zeros((1, C), f32),
        "ln2_g": jnp.ones((1, C), f32),
        "ln2_b": jnp.zeros((1, C), f32),
        "w1": w(ks[7], (C, H)),
        "b1": jnp.zeros((1, H), f32),
        "w2": w(ks[8], (H, C)),
        "b2": jnp.zeros((1, C), f32),
    }


def reference_block(x, p, n_head):
    """Plain-JAX f32 reference mirroring the PyTorch forward (eval mode)."""
    B, T, C = x.shape
    D = C // n_head
    f = lambda a: a.astype(jnp.float32)

    def ln(v, g, b):
        mu = v.mean(-1, keepdims=True)
        var = ((v - mu) ** 2).mean(-1, keepdims=True)
        return (v - mu) / jnp.sqrt(var + LN_EPS) * g[0] + b[0]

    wqkv = f(p["wqkv"])
    wq, wk, wv = wqkv[:, :C], wqkv[:, C:2 * C], wqkv[:, 2 * C:]
    bq, bk, bv = p["bqkv"][0, :C], p["bqkv"][0, C:2 * C], p["bqkv"][0, 2 * C:]

    h = ln(x, p["ln1_g"], p["ln1_b"])
    q = h @ wq + bq
    k = h @ wk + bk
    v = h @ wv + bv
    q = q.reshape(B, T, n_head, D).transpose(0, 2, 1, 3)
    k = k.reshape(B, T, n_head, D).transpose(0, 2, 1, 3)
    v = v.reshape(B, T, n_head, D).transpose(0, 2, 1, 3)
    s = jnp.einsum("bhqd,bhkd->bhqk", q, k) / math.sqrt(D)
    mask = jnp.tril(jnp.ones((T, T), bool))
    s = jnp.where(mask, s, -jnp.inf)
    a = jax.nn.softmax(s, axis=-1)
    o = jnp.einsum("bhqk,bhkd->bhqd", a, v).transpose(0, 2, 1, 3).reshape(B, T, C)
    x1 = x + (o @ f(p["wp"]) + p["bp"][0])
    h2 = ln(x1, p["ln2_g"], p["ln2_b"])
    ff = (jax.nn.gelu(h2 @ f(p["w1"]) + p["b1"][0], approximate=False)
          @ f(p["w2"]) + p["b2"][0])
    return x1 + ff


if __name__ == "__main__":
    B, T, C, NH = 2, 8, 32, 4          # batch=2, seq=8, n_embd=32, n_head=4
    key = jax.random.PRNGKey(0)
    kx, kp = jax.random.split(key)
    x = jax.random.normal(kx, (B, T, C), jnp.float32)
    params = init_params(kp, C)

    out = transformer_block(x, params, n_head=NH)
    out = jax.block_until_ready(out)

    ref = reference_block(x, params, NH)
    assert out.shape == (B, T, C)
    max_err = float(jnp.max(jnp.abs(out - ref)))
    # bf16 MXU inputs vs f32 reference -> loosened tolerance.
    assert jnp.allclose(out, ref, atol=1e-2, rtol=1e-2), \
        f"mismatch vs reference (max |err|={max_err})"
    # TODO(synk): nn.Dropout is modeled as identity (inference / p=0 semantics).
    print("KERNEL_OK")
</pallas_src>

<mosaic_0001>
module attributes {stable_mosaic.version = 11 : i64} {
  func.func @_ln_qkv_kernel(%arg0: i32, %arg1: i32, %arg2: memref<16x32xf32, #tpu.memory_space<vmem>>, %arg3: memref<1x32xf32, #tpu.memory_space<vmem>>, %arg4: memref<1x32xf32, #tpu.memory_space<vmem>>, %arg5: memref<32x96xbf16, #tpu.memory_space<vmem>>, %arg6: memref<1x96xf32, #tpu.memory_space<vmem>>, %arg7: memref<16x96xbf16, #tpu.memory_space<vmem>>, %arg8: memref<16x32xbf16, #tpu.memory_space<vmem>>) attributes {dimension_semantics = [#tpu.dimension_semantics<parallel>, #tpu.dimension_semantics<arbitrary>], iteration_bounds = array<i64: 1, 1>, scalar_prefetch = 0 : i64, scratch_operands = 1 : i64, tpu.core_type = #tpu.core_type<tc>, window_params = [{transform_indices = @transform_0, window_bounds = array<i64: 16, 32>}, {pipeline_mode = #tpu.pipeline_mode<synchronous>, transform_indices = @transform_1, window_bounds = array<i64: 1, 32>}, {pipeline_mode = #tpu.pipeline_mode<synchronous>, transform_indices = @transform_2, window_bounds = array<i64: 1, 32>}, {transform_indices = @transform_3, window_bounds = array<i64: 32, 96>}, {transform_indices = @transform_4, window_bounds = array<i64: 1, 96>}, {transform_indices = @transform_5, window_bounds = array<i64: 16, 96>}]} {
    %c0_i32 = arith.constant 0 : i32
    %0 = arith.cmpi eq, %arg1, %c0_i32 : i32
    %1 = arith.extui %0 : i1 to i32
    %c0_i32_0 = arith.constant 0 : i32
    %2 = arith.cmpi ne, %1, %c0_i32_0 : i32
    scf.if %2 {
      %c0_8 = arith.constant 0 : index
      %c0_9 = arith.constant 0 : index
      %13 = vector.load %arg2[%c0_8, %c0_9] : memref<16x32xf32, #tpu.memory_space<vmem>>, vector<16x32xf32>
      %c0_10 = arith.constant 0 : index
      %c0_11 = arith.constant 0 : index
      %14 = vector.load %arg3[%c0_10, %c0_11] : memref<1x32xf32, #tpu.memory_space<vmem>>, vector<1x32xf32>
      %15 = vector.shape_cast %14 : vector<1x32xf32> to vector<32xf32>
      %c0_12 = arith.constant 0 : index
      %c0_13 = arith.constant 0 : index
      %16 = vector.load %arg4[%c0_12, %c0_13] : memref<1x32xf32, #tpu.memory_space<vmem>>, vector<1x32xf32>
      %17 = vector.shape_cast %16 : vector<1x32xf32> to vector<32xf32>
      %cst_14 = arith.constant dense<0.000000e+00> : vector<16xf32>
      %18 = vector.multi_reduction <add>, %13, %cst_14 [1] : vector<16x32xf32> to vector<16xf32>
      %19 = vector.shape_cast %18 : vector<16xf32> to vector<16x1xf32>
      %cst_15 = arith.constant 3.200000e+01 : f32
      %20 = vector.broadcast %cst_15 : f32 to vector<16x1xf32>
      %21 = arith.divf %19, %20 : vector<16x1xf32>
      %22 = vector.broadcast %21 : vector<16x1xf32> to vector<16x32xf32>
      %23 = arith.subf %13, %22 : vector<16x32xf32>
      %24 = arith.mulf %23, %23 : vector<16x32xf32>
      %cst_16 = arith.constant dense<0.000000e+00> : vector<16xf32>
      %25 = vector.multi_reduction <add>, %24, %cst_16 [1] : vector<16x32xf32> to vector<16xf32>
      %26 = vector.shape_cast %25 : vector<16xf32> to vector<16x1xf32>
      %cst_17 = arith.constant 3.200000e+01 : f32
      %27 = vector.broadcast %cst_17 : f32 to vector<16x1xf32>
      %28 = arith.divf %26, %27 : vector<16x1xf32>
      %29 = vector.broadcast %21 : vector<16x1xf32> to vector<16x32xf32>
      %30 = arith.subf %13, %29 : vector<16x32xf32>
      %cst_18 = arith.constant 9.99999974E-6 : f32
      %31 = vector.broadcast %cst_18 : f32 to vector<16x1xf32>
      %32 = arith.addf %28, %31 : vector<16x1xf32>
      %33 = math.rsqrt %32 : vector<16x1xf32>
      %34 = vector.broadcast %33 : vector<16x1xf32> to vector<16x32xf32>
      %35 = arith.mulf %30, %34 : vector<16x32xf32>
      %36 = vector.shape_cast %15 : vector<32xf32> to vector<1x32xf32>
      %37 = vector.broadcast %36 : vector<1x32xf32> to vector<16x32xf32>
      %38 = arith.mulf %35, %37 : vector<16x32xf32>
      %39 = vector.shape_cast %17 : vector<32xf32> to vector<1x32xf32>
      %40 = vector.broadcast %39 : vector<1x32xf32> to vector<16x32xf32>
      %41 = arith.addf %38, %40 : vector<16x32xf32>
      %42 = arith.truncf %41 : vector<16x32xf32> to vector<16x32xbf16>
      %c0_19 = arith.constant 0 : index
      %c0_20 = arith.constant 0 : index
      %43 = vector.load %arg8[%c0_19, %c0_20] : memref<16x32xbf16, #tpu.memory_space<vmem>>, vector<16x32xbf16>
      tpu.vector_store %arg8[%c0_19, %c0_20], %42 {strides = array<i32>} : memref<16x32xbf16, #tpu.memory_space<vmem>>, vector<16x32xbf16>,
    } else {
    }
    %c0 = arith.constant 0 : index
    %c0_1 = arith.constant 0 : index
    %3 = vector.load %arg8[%c0, %c0_1] : memref<16x32xbf16, #tpu.memory_space<vmem>>, vector<16x32xbf16>
    %c0_2 = arith.constant 0 : index
    %c0_3 = arith.constant 0 : index
    %4 = vector.load %arg5[%c0_2, %c0_3] : memref<32x96xbf16, #tpu.memory_space<vmem>>, vector<32x96xbf16>
    %cst = arith.constant dense<0.000000e+00> : vector<16x96xf32>
    %5 = tpu.matmul %3, %4, %cst {dimension_numbers = #tpu.dot_dimension_numbers<[1], [0], [0], [1], [0, 0, 1, 1], [], []>} : vector<16x32xbf16>, vector<32x96xbf16>, vector<16x96xf32> -> vector<16x96xf32>
    %c0_4 = arith.constant 0 : index
    %c0_5 = arith.constant 0 : index
    %6 = vector.load %arg6[%c0_4, %c0_5] : memref<1x96xf32, #tpu.memory_space<vmem>>, vector<1x96xf32>
    %7 = vector.shape_cast %6 : vector<1x96xf32> to vector<96xf32>
    %8 = vector.shape_cast %7 : vector<96xf32> to vector<1x96xf32>
    %9 = vector.broadcast %8 : vector<1x96xf32> to vector<16x96xf32>
    %10 = arith.addf %5, %9 : vector<16x96xf32>
    %11 = arith.truncf %10 : vector<16x96xf32> to vector<16x96xbf16>
    %c0_6 = arith.constant 0 : index
    %c0_7 = arith.constant 0 : index
    %12 = vector.load %arg7[%c0_6, %c0_7] : memref<16x96xbf16, #tpu.memory_space<vmem>>, vector<16x96xbf16>
    tpu.vector_store %arg7[%c0_6, %c0_7], %11 {strides = array<i32>} : memref<16x96xbf16, #tpu.memory_space<vmem>>, vector<16x96xbf16>,
    return
  }
  func.func @transform_0(%arg0: i32, %arg1: i32) -> (i32, i32) {
    %c0_i32 = arith.constant 0 : i32
    %c0_i32_0 = arith.constant 0 : i32
    return %arg0, %c0_i32 : i32, i32
  }
  func.func @transform_1(%arg0: i32, %arg1: i32) -> (i32, i32) {
    %c0_i32 = arith.constant 0 : i32
    %c0_i32_0 = arith.constant 0 : i32
    %c0_i32_1 = arith.constant 0 : i32
    return %c0_i32, %c0_i32_0 : i32, i32
  }
  func.func @transform_2(%arg0: i32, %arg1: i32) -> (i32, i32) {
    %c0_i32 = arith.constant 0 : i32
    %c0_i32_0 = arith.constant 0 : i32
    %c0_i32_1 = arith.constant 0 : i32
    return %c0_i32, %c0_i32_0 : i32, i32
  }
  func.func @transform_3(%arg0: i32, %arg1: i32) -> (i32, i32) {
    %c0_i32 = arith.constant 0 : i32
    %c0_i32_0 = arith.constant 0 : i32
    return %c0_i32, %arg1 : i32, i32
  }
  func.func @transform_4(%arg0: i32, %arg1: i32) -> (i32, i32) {
    %c0_i32 = arith.constant 0 : i32
    %c0_i32_0 = arith.constant 0 : i32
    return %c0_i32, %arg1 : i32, i32
  }
  func.func @transform_5(%arg0: i32, %arg1: i32) -> (i32, i32) {
    %c0_i32 = arith.constant 0 : i32
    return %arg0, %arg1 : i32, i32
  }
}

</mosaic_0001>

<bundles_post_ra>
// kernel: tpu_custom_call.1
= control target key start
LH: loop header
LB: loop body
LE: loop exit
PB: predicated region body
PF: predicated region fallthrough
CT: control target
= control target key end

     0   :  { %10 = vsyncpa [#allocation4], 0  ;;  %s416_s0 = inlined_call_operand.hbm [shape: f32[16,32], index: 0, kind: input, shape index: {}]   ;;  %s417_s1 = inlined_call_operand.hbm [shape: f32[1,32], index: 1, kind: input, shape index: {}]   ;;  %s418_s2 = inlined_call_operand.vmem [shape: f32[1,32], index: 2, kind: input, shape index: {}]   ;;  %s419_s3 = inlined_call_operand.hbm [shape: bf16[32,96], index: 3, kind: input, shape index: {}]   ;;  %s420_s4 = inlined_call_operand.vmem [shape: f32[1,96], index: 4, kind: input, shape index: {}]   ;;  %s421_s5 = inlined_call_operand.hbm [shape: bf16[16,96], index: 5, kind: output, shape index: {}]  }
   0x1   :  { %11 = vsyncpa [#allocation7], 0  ;;  %s31_s20 = sshll.u32 %s417_s1, 4  ;;  %s32_s20 = int_to_ptr.hbm [resolvable:$true] %s31_s20 }
   0x2   :  { %12 = vsyncpa [#allocation5], 0  ;;  %s348_s21 = smov [#allocation6]   ;;  %s17_s25 = sshll.u32 %s416_s0, 4  ;;  %s18_s25 = int_to_ptr.hbm [resolvable:$true] %s17_s25 }
   0x3   :  { %s33_s22 = sshll.u32 %s348_s21, 4  ;;  %s349_s26 = smov [#allocation3]   ;;  %s34_s22 = int_to_ptr.vmem [resolvable:$true] %s33_s22 }
   0x4   :  { %36 = dma.hbm_to_vmem [thread:$0]  %s32_s20, 16, %s34_s22, [#allocation7]  }
   0x5   :  { %s19_s27 = sshll.u32 %s349_s26, 4  ;;  %s350_s28 = smov 128   ;;  %s20_s27 = int_to_ptr.vmem [resolvable:$true] %s19_s27 }
   0x6   :  { %s351_s29 = smov 8   ;;  %s43_s1 = sshll.u32 %s419_s3, 4  ;;  %s44_s1 = int_to_ptr.hbm [resolvable:$true] %s43_s1 }
   0x7   :  { %25 = dma.hbm_to_vmem [thread:$0]  %s18_s25, 256, %s20_s27, [#allocation4], %s350_s28, %s350_s28, %s351_s29  }
   0x8   :  { %s352_s7 = smov [#allocation8]   ;;  %s353_s9 = smov 64  }
   0x9   :  { %s45_s8 = sshll.u32 %s352_s7, 4  ;;  %s354_s10 = smov 4   ;;  %s46_s8 = int_to_ptr.vmem [resolvable:$true] %s45_s8 }
   0xa   :  { %51 = dma.hbm_to_vmem [thread:$0]  %s44_s1, 256, %s46_s8, [#allocation7], %s353_s9, %s353_s9, %s354_s10  }
   0xb   :  { %342 = dma.done.wait [#allocation4], 256  }
   0xc   :  { %343 = vsyncadd [#allocation4], 4294967040 }
   0xd   :  { %344 = dma.done.wait [#allocation7], 272  }
   0xe   :  { %345 = vsyncadd [#allocation7], 4294967024  ;;  %vm75_vm0 = vcmask 261120   ;;  %v71_v0 = vld [vmem:[#allocation3] sm:$0xff]  ;;  %v72_v2 = vld [vmem:[#allocation3 + $0x8] sm:$0xff]  ;;  %v355_v4 = vmov 32.0  }
   0xf   :  { %v76_v1 = vsel %vm75_vm0, %v71_v0, 0.0  ;;  %v79_v3 = vsel %vm75_vm0, %v72_v2, 0.0  ;;  %240 = vrcp.f32 %v355_v4  ;;  %v227_v24 = vld [vmem:[#allocation8 + $0x8] sm:$0xff]  ;;  %v226_v27 = vld [vmem:[#allocation8] sm:$0xff]  ;;  %v237_v37 = vld [vmem:[#allocation6] ss:$0 sm:$0xff] }
  0x10   :  { %77 = vadd.xlane.f32.xlu0 %v76_v1  ;;  %179 = vmatpush.bf16.msra.mxu0 %v227_v24  ;;  %v238_v40 = vld [vmem:[%s418_s2] ss:$0 sm:$0xff]  ;;  %vm139_vm6 = vcmask 257024   ;;  %vm189_vm9 = vcmask 781312   ;;  %s356_s12 = smov [#allocation9]   ;;  %s198_s16 = sshll.u32 %s421_s5, 4  ;;  %s199_s16 = int_to_ptr.hbm [resolvable:$true] %s198_s16 }
  0x11   :  { %v239_v54 = vld [vmem:[%s420_s4] ss:$0 sm:$0xff]  ;;  %s196_s13 = sshll.u32 %s356_s12, 4  ;;  %s197_s13 = int_to_ptr.vmem [resolvable:$true] %s196_s13 }
  0x14   :  { %180 = vmatpush.bf16.msra.mxu0 %v226_v27 }
  0x15   :  { %v241_v5 = vpop.eup %240 }
  0x16   :  { %v83_v6 = vmul.f32 32.0, %v241_v5  ;;  %vm87_vm1 = vweird.f32 %v241_v5 }
  0x18   :  { %80 = vadd.xlane.f32.xlu0 %v79_v3  ;;  %v84_v7 = vsub.f32 1.0, %v83_v6 }
  0x1a   :  { %v85_v8 = vmul.f32 %v241_v5, %v84_v7 }
  0x1c   :  { %v86_v9 = vadd.f32 %v241_v5, %v85_v8 }
  0x1e   :  { %v88_v10 = vsel %vm87_vm1, %v241_v5, %v86_v9 }
  0x83   :  { %v78_v11 = vpop.xlane.xlu0 %77 }
  0x84   :  { %v89_v12 = vmul.f32 %v88_v10, %v78_v11 }
  0x86   :  { %v91_v13 = vsub.f32 %v71_v0, %v89_v12 }
  0x88   :  { %v93_v14 = vmul.f32 %v91_v13, %v91_v13 }
  0x8a   :  { %v95_v15 = vsel %vm75_vm0, %v93_v14, 0.0 }
  0x8b   :  { %96 = vadd.xlane.f32.xlu1 %v95_v15  ;;  %v81_v16 = vpop.xlane.xlu0 %80 }
  0x8c   :  { %v90_v17 = vmul.f32 %v88_v10, %v81_v16 }
  0x8e   :  { %v92_v18 = vsub.f32 %v72_v2, %v90_v17 }
  0x90   :  { %v94_v19 = vmul.f32 %v92_v18, %v92_v18 }
  0x92   :  { %v98_v20 = vsel %vm75_vm0, %v94_v19, 0.0 }
  0x93   :  { %99 = vadd.xlane.f32.xlu1 %v98_v20 }
  0xfe   :  { %v97_v21 = vpop.xlane.xlu1 %96 }
  0xff   :  { %v101_v22 = vmul.f32 %v97_v21, %v88_v10 }
 0x101   :  { %v103_v23 = vadd.f32 1e-05, %v101_v22 }
 0x103   :  { %242 = vrsqrt.f32 %v103_v23  ;;  %vm111_vm3 = vweird.f32 %v103_v23 }
 0x106   :  { %v100_v25 = vpop.xlane.xlu1 %99 }
 0x107   :  { %v102_v26 = vmul.f32 %v100_v25, %v88_v10 }
 0x109   :  { %v243_v28 = vpop.eup %242  ;;  %v104_v29 = vadd.f32 1e-05, %v102_v26 }
 0x10a   :  { %v106_v30 = vmul.f32 %v243_v28, %v103_v23  ;;  %vm112_vm2 = vweird.f32 %v243_v28 }
 0x10b   :  { %244 = vrsqrt.f32 %v104_v29  ;;  %vm113_vm4 = vmor %vm111_vm3, %vm112_vm2  ;;  %vm121_vm7 = vweird.f32 %v104_v29 }
 0x10c   :  { %v107_v31 = vmul.f32 %v243_v28, %v106_v30 }
 0x10e   :  { %v108_v32 = vmul.f32 0.5, %v107_v31 }
 0x110   :  { %v109_v33 = vsub.f32 1.5, %v108_v32 }
 0x111   :  { %v245_v34 = vpop.eup %244 }
 0x112   :  { %v110_v35 = vmul.f32 %v243_v28, %v109_v33  ;;  %v116_v36 = vmul.f32 %v245_v34, %v104_v29  ;;  %vm122_vm5 = vweird.f32 %v245_v34 }
 0x113   :  { %vm123_vm8 = vmor %vm121_vm7, %vm122_vm5 }
 0x114   :  { %v114_v38 = vsel %vm113_vm4, %v243_v28, %v110_v35  ;;  %v117_v39 = vmul.f32 %v245_v34, %v116_v36 }
 0x115   :  { %v125_v41 = vmul.f32 %v114_v38, %v91_v13 }
 0x116   :  { %v118_v42 = vmul.f32 0.5, %v117_v39 }
 0x117   :  { %v130_v43 = vmul.f32 %v237_v37, %v125_v41 }
 0x118   :  { %v119_v44 = vsub.f32 1.5, %v118_v42 }
 0x119   :  { %v135_v45 = vadd.f32 %v238_v40, %v130_v43 }
 0x11a   :  { %v120_v46 = vmul.f32 %v245_v34, %v119_v44 }
 0x11b   :  { %v137_v47 = vpack.c.bf16 %v135_v45, %v135_v45 }
 0x11c   :  { %v124_v48 = vsel %vm123_vm8, %v245_v34, %v120_v46 }
 0x11d   :  { %140 = vst.msk [vmem:[#allocation2] sm:$0xf] %vm139_vm6, %v137_v47  ;;  %v126_v49 = vmul.f32 %v124_v48, %v92_v18 }
 0x11f   :  { %v131_v50 = vmul.f32 %v237_v37, %v126_v49 }
 0x121   :  { %v136_v51 = vadd.f32 %v238_v40, %v131_v50 }
 0x123   :  { %v138_v52 = vpack.c.bf16 %v136_v51, %v136_v51 }
 0x125   :  { %141 = vst.msk [vmem:[#allocation2 + $0x4] sm:$0xf] %vm139_vm6, %v138_v52 }
 0x12c   :  { %v225_v53 = vld [vmem:[#allocation2] sm:$0xff] }
 0x12d   :  { %224 = vmatmul.msk.bf16.vlgmr.msra.gmra.mxu0 %vm75_vm0, %v225_v53 }
 0x1aa   :  { %v182_v55 = vpop.f32.mrf.mxu0 }
 0x1ab   :  { %v183_v56 = vadd.f32 %v239_v54, %v182_v55 }
 0x1ad   :  { %v187_v57 = vpack.c.bf16 %v183_v56, %v183_v56 }
 0x1af   :  { %190 = vst.msk [vmem:[#allocation9] sm:$0xf] %vm189_vm9, %v187_v57 }
 0x1b2   :  { %v184_v58 = vpop.f32.mrf.mxu0 }
 0x1b3   :  { %v185_v59 = vadd.f32 %v239_v54, %v184_v58 }
 0x1b5   :  { %v188_v60 = vpack.c.bf16 %v185_v59, %v185_v59 }
 0x1b7   :  { %191 = vst.msk [vmem:[#allocation9 + $0x4] sm:$0xf] %vm189_vm9, %v188_v60 }
 0x1b8   :  { %204 = dma.vmem_to_hbm [thread:$0]  %s197_s13, 128, %s199_s16, [#allocation5], %s353_s9, %s353_s9, %s354_s10  }
 0x1b9   :  { %346 = dma.done.wait [#allocation5], 128  }
 0x1ba   :  { %347 = vsyncadd [#allocation5], 4294967168 }
 0x1bb   :  { %209 = vsyncpa [#allocation4], 1 }
 0x1bc   :  { %210 = vsyncpa [#allocation7], 1 }
 0x1bd   :  { %211 = vsyncpa [#allocation5], 1 }

</bundles_post_ra>
